<compile_context>
chip_gen: v7x
topology: tpu7x:2x2x1
jax: 0.10.0
libtpu: 0.0.40
codegen_flags: <defaults>
</compile_context>

<pallas_src>
import numpy as np
import jax
import jax.numpy as jnp
from jax.experimental import pallas as pl
from jax.experimental.pallas import tpu as pltpu

N_BLOCK = 128   # nodes per grid block (lane/MXU aligned; use 256 on v6e/v7x for bigger workloads)
G_LANES = 128   # per-block graph-score slots == lane width of the output tile

# row layout of the small resident f32 "vector" parameter buffer
_ROW_B1, _ROW_B2, _ROW_WL, _ROW_BL, _V_ROWS = 0, 1, 2, 3, 8


def _round_up(v, m):
    return ((v + m - 1) // m) * m


@jax.jit
def net_gnn_forward(a_blk, x_blk, pool_t_blk, w_bf, vec, graph_slot):
    """Packed-block NetGNN forward.

    a_blk      : [NB, N_BLOCK, N_BLOCK] bf16  block-diagonal normalized adjacency per node block
    x_blk      : [NB, N_BLOCK, f_pad]   bf16  node features
    pool_t_blk : [NB, N_BLOCK, G_LANES] f32   TRANSPOSED mean-pool matrix (node -> graph slot)
    w_bf       : [w_rows, h_pad]        bf16  packed weights: W2 rows [0,h_pad), W1 rows [h_pad,..)
    vec        : [8, h_pad]             f32   rows: b1, b2, w_lin, b_lin(broadcast over lanes)
    graph_slot : [num_graphs]           int32 flat (block*G_LANES + slot) position of each graph
    returns    : [num_graphs] f32 per-graph scores (== lin(pool(relu(conv2(relu(conv1)))))).squeeze(-1)
    """
    nb, n_block, _ = a_blk.shape
    f_pad = x_blk.shape[2]
    g_lanes = pool_t_blk.shape[2]
    w_rows, h_pad = w_bf.shape
    row_w2, row_w1 = 0, h_pad           # layout convention from pack_params

    def kernel(a_ref, x_ref, pool_t_ref, w_ref, v_ref, out_ref):
        a = a_ref[...]                                    # (n_block, n_block) bf16
        w1 = w_ref[row_w1:row_w1 + f_pad, :]              # (f_pad, h_pad) bf16, resident
        w2 = w_ref[row_w2:row_w2 + h_pad, :]              # (h_pad, h_pad) bf16, resident
        b1 = v_ref[_ROW_B1:_ROW_B1 + 1, :]                # (1, h_pad) f32
        b2 = v_ref[_ROW_B2:_ROW_B2 + 1, :]
        wl = v_ref[_ROW_WL:_ROW_WL + 1, :]
        bl = v_ref[_ROW_BL:_ROW_BL + 1, 0:g_lanes]        # (1, g_lanes) f32 (b_lin broadcast)

        # GCNConv 1, reordered as (A @ X) @ W1: contraction over f_pad (8) instead of h_pad (128).
        ax = jnp.dot(a, x_ref[...], preferred_element_type=jnp.float32)               # (n, f_pad)
        h = jnp.dot(ax.astype(jnp.bfloat16), w1, preferred_element_type=jnp.float32) + b1
        h = jnp.maximum(h, 0.0)

        # GCNConv 2: A @ (H @ W2) + b2, ReLU  (bf16 MXU operands, f32 accumulation).
        hw = jnp.dot(h.astype(jnp.bfloat16), w2, preferred_element_type=jnp.float32)
        h = jnp.dot(a, hw.astype(jnp.bfloat16), preferred_element_type=jnp.float32) + b2
        h = jnp.maximum(h, 0.0)

        # Linear(hidden, 1) per node (VPU mul + lane reduce), then global_mean_pool via the
        # transposed pooling matrix so per-graph scores come out lane-dense: one unmasked
        # (1, G_LANES) store per block, no redundant lane broadcast.
        node_lin = jnp.sum(h * wl, axis=-1, keepdims=True)                            # (n, 1) f32
        weighted = pool_t_ref[...] * node_lin                                          # (n, g_lanes)
        ones_row = jnp.ones((1, n_block), jnp.float32)
        out_ref[...] = jnp.dot(ones_row, weighted,
                               preferred_element_type=jnp.float32) + bl                # (1, g_lanes)

    out = pl.pallas_call(
        kernel,
        out_shape=jax.ShapeDtypeStruct((nb, 1, g_lanes), jnp.float32),
        grid=(nb,),
        in_specs=[
            pl.BlockSpec((None, n_block, n_block), lambda b: (b, 0, 0)),
            pl.BlockSpec((None, n_block, f_pad), lambda b: (b, 0, 0)),
            pl.BlockSpec((None, n_block, g_lanes), lambda b: (b, 0, 0)),
            pl.BlockSpec((w_rows, h_pad), lambda b: (0, 0)),      # resident weights, one DMA
            pl.BlockSpec((_V_ROWS, h_pad), lambda b: (0, 0)),     # resident bias/readout, one DMA
        ],
        out_specs=pl.BlockSpec((None, 1, g_lanes), lambda b: (b, 0, 0)),
        compiler_params=pltpu.CompilerParams(
            dimension_semantics=("parallel",),          # node blocks are independent
            vmem_limit_bytes=32 * 1024 * 1024,          # explicit, portable across v5e/v6e/v7x
        ),
    )(a_blk, x_blk, pool_t_blk, w_bf, vec)

    # Gather the real per-graph scores out of the packed (NB, 1, G_LANES) lane-dense tiles.
    return jnp.take(out.reshape(nb * g_lanes), graph_slot)


# ----------------------------- host-side packing (producer) -----------------------------

def build_normalized_adjacency(edge_index, num_nodes):
    """Dense D^-1/2 (A + I) D^-1/2 (gcn_norm, add_self_loops=True).

    .set() de-duplicates repeated edges (unweighted semantics); explicit self loops in
    edge_index are dropped before self loops are added exactly once.
    """
    src, dst = edge_index
    a = jnp.zeros((num_nodes, num_nodes), jnp.float32).at[src, dst].set(1.0)
    eye = jnp.eye(num_nodes, dtype=jnp.float32)
    a = a * (1.0 - eye) + eye
    deg = jnp.sum(a, axis=1)
    d_inv_sqrt = jnp.where(deg > 0, 1.0 / jnp.sqrt(deg), 0.0)
    return d_inv_sqrt[:, None] * a * d_inv_sqrt[None, :]


def build_mean_pool_matrix(batch, num_graphs):
    n = batch.shape[0]
    onehot = (batch[None, :] == jnp.arange(num_graphs)[:, None]).astype(jnp.float32)
    counts = jnp.maximum(jnp.sum(onehot, axis=1, keepdims=True), 1.0)
    return onehot / counts  # [G, N]


def pack_inputs(x, edge_index, batch, num_graphs, n_block=N_BLOCK):
    """Pack whole graphs into block-diagonal node blocks; pad + cast ONCE at the producer.

    Assumes (like PyG batched Data) that `batch` is sorted and each graph's nodes are contiguous.
    Returns bf16/f32 kernel operands plus the flat output slot of every graph.
    """
    x_np = np.asarray(x, np.float32)
    batch_np = np.asarray(batch)
    n_total, n_feat = x_np.shape
    f_pad = _round_up(max(n_feat, 8), 8)

    counts = np.bincount(batch_np, minlength=num_graphs)
    starts = np.concatenate([[0], np.cumsum(counts)[:-1]])
    assert np.all(np.diff(batch_np) >= 0), "batch vector must be sorted (PyG layout)"
    assert counts.max() <= n_block, "a single graph may not span multiple node blocks"

    # greedy, order-preserving assignment of graphs to node blocks
    blocks, cur, cur_nodes = [], [], 0
    for g in range(num_graphs):
        c = int(counts[g])
        if (cur_nodes + c > n_block or len(cur) == G_LANES) and cur:
            blocks.append(cur)
            cur, cur_nodes = [], 0
        cur.append(g)
        cur_nodes += c
    if cur:
        blocks.append(cur)
    nb = len(blocks)

    a_full = np.asarray(build_normalized_adjacency(edge_index, n_total), np.float32)

    a_blk = np.zeros((nb, n_block, n_block), np.float32)
    x_blk = np.zeros((nb, n_block, f_pad), np.float32)
    pool_t_blk = np.zeros((nb, n_block, G_LANES), np.float32)
    slot = np.zeros((num_graphs,), np.int32)
    for b, graphs in enumerate(blocks):
        off = 0
        for j, g in enumerate(graphs):
            s, c = int(starts[g]), int(counts[g])
            a_blk[b, off:off + c, off:off + c] = a_full[s:s + c, s:s + c]
            x_blk[b, off:off + c, :n_feat] = x_np[s:s + c]
            pool_t_blk[b, off:off + c, j] = 1.0 / max(c, 1)
            slot[g] = b * G_LANES + j
            off += c

    return (jnp.asarray(a_blk, jnp.bfloat16),
            jnp.asarray(x_blk, jnp.bfloat16),
            jnp.asarray(pool_t_blk, jnp.float32),
            jnp.asarray(slot, jnp.int32))


def pack_params(w1, b1, w2, b2, w_lin, b_lin):
    """Pack weights as a resident bf16 buffer and bias/readout vectors as a resident f32 buffer."""
    n_feat, hidden = w1.shape
    f_pad = _round_up(max(n_feat, 8), 8)
    h_pad = _round_up(max(hidden, 128), 128)
    w_rows = _round_up(h_pad + f_pad, 16)     # bf16 sublane packing

    w_buf = np.zeros((w_rows, h_pad), np.float32)
    w_buf[0:hidden, 0:hidden] = np.asarray(w2, np.float32)               # W2 at rows [0, h_pad)
    w_buf[h_pad:h_pad + n_feat, 0:hidden] = np.asarray(w1, np.float32)   # W1 at rows [h_pad, ...)

    vec = np.zeros((_V_ROWS, h_pad), np.float32)
    vec[_ROW_B1, 0:hidden] = np.asarray(b1, np.float32)
    vec[_ROW_B2, 0:hidden] = np.asarray(b2, np.float32)
    vec[_ROW_WL, 0:hidden] = np.asarray(w_lin, np.float32)[:, 0]
    vec[_ROW_BL, :] = float(np.asarray(b_lin, np.float32)[0])   # b_lin replicated across lanes so
                                                                # the lane-dense score row gets +b_lin
    return jnp.asarray(w_buf, jnp.bfloat16), jnp.asarray(vec, jnp.float32)


# ------------------------------------ reference & demo ------------------------------------

def glorot(key, shape):
    fan_in, fan_out = shape
    limit = jnp.sqrt(6.0 / (fan_in + fan_out))
    return jax.random.uniform(key, shape, jnp.float32, -limit, limit)


def reference_forward(a_hat, x, pool, w1, b1, w2, b2, w_lin, b_lin):
    """Pure-JAX reference mirroring the kernel's math ((A@X)@W1 order, bf16 operands, f32 acc)."""
    bf = jnp.bfloat16
    a = a_hat.astype(bf)
    ax = jnp.dot(a, x.astype(bf), preferred_element_type=jnp.float32)
    h = jnp.dot(ax.astype(bf), w1.astype(bf), preferred_element_type=jnp.float32) + b1
    h = jnp.maximum(h, 0.0)
    hw = jnp.dot(h.astype(bf), w2.astype(bf), preferred_element_type=jnp.float32)
    h = jnp.dot(a, hw.astype(bf), preferred_element_type=jnp.float32) + b2
    h = jnp.maximum(h, 0.0)
    pooled = pool @ h
    return pooled @ w_lin[:, 0] + b_lin[0]


if __name__ == "__main__":
    in_channels = 4
    hidden_channels = 32
    nodes_per_graph = 16
    num_graphs = 16                 # 256 nodes total -> 2 packed node blocks of 8 graphs each
    num_nodes = nodes_per_graph * num_graphs

    key = jax.random.PRNGKey(0)
    k_x, k_w1, k_b1, k_w2, k_b2, k_wl, k_bl = jax.random.split(key, 7)

    # deterministic synthetic structure: 16-node bidirectional ring per graph
    edges = []
    for g in range(num_graphs):
        base = g * nodes_per_graph
        for i in range(nodes_per_graph):
            u, v = base + i, base + (i + 1) % nodes_per_graph
            edges.append((u, v))
            edges.append((v, u))
    edge_index = jnp.array(edges, jnp.int32).T                     # [2, E]
    batch_vec = jnp.repeat(jnp.arange(num_graphs, dtype=jnp.int32), nodes_per_graph)

    x = jax.random.normal(k_x, (num_nodes, in_channels), jnp.float32)

    w1 = glorot(k_w1, (in_channels, hidden_channels))
    b1 = 0.1 * jax.random.normal(k_b1, (hidden_channels,), jnp.float32)
    w2 = glorot(k_w2, (hidden_channels, hidden_channels))
    b2 = 0.1 * jax.random.normal(k_b2, (hidden_channels,), jnp.float32)
    w_lin = glorot(k_wl, (hidden_channels, 1))
    b_lin = jax.random.uniform(k_bl, (1,), jnp.float32, -0.1, 0.1)

    # host-side packing: pad + bf16 cast happen once at the producer, not per jitted call
    a_blk, x_blk, pool_t_blk, graph_slot = pack_inputs(x, edge_index, batch_vec, num_graphs)
    w_bf, vec = pack_params(w1, b1, w2, b2, w_lin, b_lin)

    out = net_gnn_forward(a_blk, x_blk, pool_t_blk, w_bf, vec, graph_slot)
    out = jax.block_until_ready(out)

    a_full = build_normalized_adjacency(edge_index, num_nodes)
    pool_full = build_mean_pool_matrix(batch_vec, num_graphs)
    ref = reference_forward(a_full, x, pool_full, w1, b1, w2, b2, w_lin, b_lin)

    assert out.shape == (num_graphs,)
    assert jnp.allclose(out, ref, atol=2e-3, rtol=2e-3), (out, ref)
    print("KERNEL_OK")
</pallas_src>

<mosaic_0001>
module attributes {stable_mosaic.version = 11 : i64} {
  func.func @kernel(%arg0: i32, %arg1: memref<1x128x128xbf16, #tpu.memory_space<vmem>>, %arg2: memref<1x128x8xbf16, #tpu.memory_space<vmem>>, %arg3: memref<1x128x128xf32, #tpu.memory_space<vmem>>, %arg4: memref<144x128xbf16, #tpu.memory_space<vmem>>, %arg5: memref<8x128xf32, #tpu.memory_space<vmem>>, %arg6: memref<1x1x128xf32, #tpu.memory_space<vmem>>) attributes {dimension_semantics = [#tpu.dimension_semantics<parallel>], iteration_bounds = array<i64: 2>, scalar_prefetch = 0 : i64, scratch_operands = 0 : i64, tpu.core_type = #tpu.core_type<tc>, window_params = [{transform_indices = @transform_0, window_bounds = array<i64: 1, 128, 128>}, {transform_indices = @transform_1, window_bounds = array<i64: 1, 128, 8>}, {transform_indices = @transform_2, window_bounds = array<i64: 1, 128, 128>}, {pipeline_mode = #tpu.pipeline_mode<synchronous>, transform_indices = @transform_3, window_bounds = array<i64: 144, 128>}, {pipeline_mode = #tpu.pipeline_mode<synchronous>, transform_indices = @transform_4, window_bounds = array<i64: 8, 128>}, {transform_indices = @transform_5, window_bounds = array<i64: 1, 1, 128>}]} {
    %c0 = arith.constant 0 : index
    %c0_0 = arith.constant 0 : index
    %c0_1 = arith.constant 0 : index
    %0 = vector.load %arg1[%c0, %c0_0, %c0_1] : memref<1x128x128xbf16, #tpu.memory_space<vmem>>, vector<1x128x128xbf16>
    %1 = vector.shape_cast %0 : vector<1x128x128xbf16> to vector<128x128xbf16>
    %c128 = arith.constant 128 : index
    %c0_2 = arith.constant 0 : index
    %2 = vector.load %arg4[%c128, %c0_2] : memref<144x128xbf16, #tpu.memory_space<vmem>>, vector<8x128xbf16>
    %c0_3 = arith.constant 0 : index
    %c0_4 = arith.constant 0 : index
    %3 = vector.load %arg4[%c0_3, %c0_4] : memref<144x128xbf16, #tpu.memory_space<vmem>>, vector<128x128xbf16>
    %c0_5 = arith.constant 0 : index
    %c0_6 = arith.constant 0 : index
    %4 = vector.load %arg5[%c0_5, %c0_6] : memref<8x128xf32, #tpu.memory_space<vmem>>, vector<1x128xf32>
    %c1 = arith.constant 1 : index
    %c0_7 = arith.constant 0 : index
    %5 = vector.load %arg5[%c1, %c0_7] : memref<8x128xf32, #tpu.memory_space<vmem>>, vector<1x128xf32>
    %c2 = arith.constant 2 : index
    %c0_8 = arith.constant 0 : index
    %6 = vector.load %arg5[%c2, %c0_8] : memref<8x128xf32, #tpu.memory_space<vmem>>, vector<1x128xf32>
    %c3 = arith.constant 3 : index
    %c0_9 = arith.constant 0 : index
    %7 = vector.load %arg5[%c3, %c0_9] : memref<8x128xf32, #tpu.memory_space<vmem>>, vector<1x128xf32>
    %c0_10 = arith.constant 0 : index
    %c0_11 = arith.constant 0 : index
    %c0_12 = arith.constant 0 : index
    %8 = vector.load %arg2[%c0_10, %c0_11, %c0_12] : memref<1x128x8xbf16, #tpu.memory_space<vmem>>, vector<1x128x8xbf16>
    %9 = vector.shape_cast %8 : vector<1x128x8xbf16> to vector<128x8xbf16>
    %cst = arith.constant dense<0.000000e+00> : vector<128x8xf32>
    %10 = tpu.matmul %1, %9, %cst {dimension_numbers = #tpu.dot_dimension_numbers<[1], [0], [0], [1], [0, 0, 1, 1], [], []>} : vector<128x128xbf16>, vector<128x8xbf16>, vector<128x8xf32> -> vector<128x8xf32>
    %11 = arith.truncf %10 : vector<128x8xf32> to vector<128x8xbf16>
    %cst_13 = arith.constant dense<0.000000e+00> : vector<128x128xf32>
    %12 = tpu.matmul %11, %2, %cst_13 {dimension_numbers = #tpu.dot_dimension_numbers<[1], [0], [0], [1], [0, 0, 1, 1], [], []>} : vector<128x8xbf16>, vector<8x128xbf16>, vector<128x128xf32> -> vector<128x128xf32>
    %13 = vector.broadcast %4 : vector<1x128xf32> to vector<128x128xf32>
    %14 = arith.addf %12, %13 : vector<128x128xf32>
    %cst_14 = arith.constant 0.000000e+00 : f32
    %15 = vector.broadcast %cst_14 : f32 to vector<128x128xf32>
    %16 = arith.maximumf %14, %15 : vector<128x128xf32>
    %17 = arith.truncf %16 : vector<128x128xf32> to vector<128x128xbf16>
    %cst_15 = arith.constant dense<0.000000e+00> : vector<128x128xf32>
    %18 = tpu.matmul %17, %3, %cst_15 {dimension_numbers = #tpu.dot_dimension_numbers<[1], [0], [0], [1], [0, 0, 1, 1], [], []>} : vector<128x128xbf16>, vector<128x128xbf16>, vector<128x128xf32> -> vector<128x128xf32>
    %19 = arith.truncf %18 : vector<128x128xf32> to vector<128x128xbf16>
    %cst_16 = arith.constant dense<0.000000e+00> : vector<128x128xf32>
    %20 = tpu.matmul %1, %19, %cst_16 {dimension_numbers = #tpu.dot_dimension_numbers<[1], [0], [0], [1], [0, 0, 1, 1], [], []>} : vector<128x128xbf16>, vector<128x128xbf16>, vector<128x128xf32> -> vector<128x128xf32>
    %21 = vector.broadcast %5 : vector<1x128xf32> to vector<128x128xf32>
    %22 = arith.addf %20, %21 : vector<128x128xf32>
    %cst_17 = arith.constant 0.000000e+00 : f32
    %23 = vector.broadcast %cst_17 : f32 to vector<128x128xf32>
    %24 = arith.maximumf %22, %23 : vector<128x128xf32>
    %25 = vector.broadcast %6 : vector<1x128xf32> to vector<128x128xf32>
    %26 = arith.mulf %24, %25 : vector<128x128xf32>
    %cst_18 = arith.constant dense<0.000000e+00> : vector<128xf32>
    %27 = vector.multi_reduction <add>, %26, %cst_18 [1] : vector<128x128xf32> to vector<128xf32>
    %28 = vector.shape_cast %27 : vector<128xf32> to vector<128x1xf32>
    %c0_19 = arith.constant 0 : index
    %c0_20 = arith.constant 0 : index
    %c0_21 = arith.constant 0 : index
    %29 = vector.load %arg3[%c0_19, %c0_20, %c0_21] : memref<1x128x128xf32, #tpu.memory_space<vmem>>, vector<1x128x128xf32>
    %30 = vector.shape_cast %29 : vector<1x128x128xf32> to vector<128x128xf32>
    %31 = vector.broadcast %28 : vector<128x1xf32> to vector<128x128xf32>
    %32 = arith.mulf %30, %31 : vector<128x128xf32>
    %cst_22 = arith.constant 1.000000e+00 : f32
    %33 = vector.broadcast %cst_22 : f32 to vector<1x128xf32>
    %cst_23 = arith.constant dense<0.000000e+00> : vector<1x128xf32>
    %34 = tpu.matmul %33, %32, %cst_23 {dimension_numbers = #tpu.dot_dimension_numbers<[1], [0], [0], [1], [0, 0, 1, 1], [], []>} : vector<1x128xf32>, vector<128x128xf32>, vector<1x128xf32> -> vector<1x128xf32>
    %35 = arith.addf %34, %7 : vector<1x128xf32>
    %c0_24 = arith.constant 0 : index
    %c0_25 = arith.constant 0 : index
    %c0_26 = arith.constant 0 : index
    %36 = vector.load %arg6[%c0_24, %c0_25, %c0_26] : memref<1x1x128xf32, #tpu.memory_space<vmem>>, vector<1x1x128xf32>
    %37 = vector.shape_cast %36 : vector<1x1x128xf32> to vector<1x128xf32>
    %38 = vector.shape_cast %35 : vector<1x128xf32> to vector<1x1x128xf32>
    tpu.vector_store %arg6[%c0_24, %c0_25, %c0_26], %38 {strides = array<i32>} : memref<1x1x128xf32, #tpu.memory_space<vmem>>, vector<1x1x128xf32>,
    return
  }
  func.func @transform_0(%arg0: i32) -> (i32, i32, i32) {
    %c0_i32 = arith.constant 0 : i32
    %c0_i32_0 = arith.constant 0 : i32
    %c0_i32_1 = arith.constant 0 : i32
    return %arg0, %c0_i32, %c0_i32_0 : i32, i32, i32
  }
  func.func @transform_1(%arg0: i32) -> (i32, i32, i32) {
    %c0_i32 = arith.constant 0 : i32
    %c0_i32_0 = arith.constant 0 : i32
    %c0_i32_1 = arith.constant 0 : i32
    return %arg0, %c0_i32, %c0_i32_0 : i32, i32, i32
  }
  func.func @transform_2(%arg0: i32) -> (i32, i32, i32) {
    %c0_i32 = arith.constant 0 : i32
    %c0_i32_0 = arith.constant 0 : i32
    %c0_i32_1 = arith.constant 0 : i32
    return %arg0, %c0_i32, %c0_i32_0 : i32, i32, i32
  }
  func.func @transform_3(%arg0: i32) -> (i32, i32) {
    %c0_i32 = arith.constant 0 : i32
    %c0_i32_0 = arith.constant 0 : i32
    %c0_i32_1 = arith.constant 0 : i32
    return %c0_i32, %c0_i32_0 : i32, i32
  }
  func.func @transform_4(%arg0: i32) -> (i32, i32) {
    %c0_i32 = arith.constant 0 : i32
    %c0_i32_0 = arith.constant 0 : i32
    %c0_i32_1 = arith.constant 0 : i32
    return %c0_i32, %c0_i32_0 : i32, i32
  }
  func.func @transform_5(%arg0: i32) -> (i32, i32, i32) {
    %c0_i32 = arith.constant 0 : i32
    %c0_i32_0 = arith.constant 0 : i32
    %c0_i32_1 = arith.constant 0 : i32
    return %arg0, %c0_i32, %c0_i32_0 : i32, i32, i32
  }
}

</mosaic_0001>

<bundles_post_ra>
// kernel: net_gnn_forward.1
= control target key start
LH: loop header
LB: loop body
LE: loop exit
PB: predicated region body
PF: predicated region fallthrough
CT: control target
= control target key end

     0   :  { %10 = vsyncpa [#allocation3], 0  ;;  %s2017_s0 = inlined_call_operand.vmem [shape: bf16[2,128,128], index: 0, kind: input, shape index: {}]   ;;  %s2018_s1 = inlined_call_operand.vmem [shape: bf16[2,128,8], index: 1, kind: input, shape index: {}]   ;;  %s2019_s2 = inlined_call_operand.hbm [shape: f32[2,128,128], index: 2, kind: input, shape index: {}]   ;;  %s2020_s3 = inlined_call_operand.hbm [shape: bf16[144,128], index: 3, kind: input, shape index: {}]   ;;  %s2021_s4 = inlined_call_operand.vmem [shape: f32[8,128], index: 4, kind: input, shape index: {}]   ;;  %s2022_s5 = inlined_call_operand.vmem [shape: f32[2,1,128], index: 5, kind: output, shape index: {}]  }
   0x1   :  { %12 = vsyncpa [#allocation3 + $0x1], 0 }
   0x2   :  { %13 = vsyncpa [#allocation5], 0  ;;  %s1745_s18 = smov 0   ;;  %s1747_s19 = smov 0  }
   0x3   :  { %s1749_s20 = smov 0   ;;  %s1751_s21 = smov 0  }
   0x4 LB: > { %s1764_s22 = sadd.s32 4294967295, %s1703_s21   ;;  %p91_p0 = scmp.ne.s32.totalorder %s1695_s19, %s1691_s18  ;;  %s1703_s21 = sphi %s1751_s21, %s2038_s21   ;;  %s1699_s20 = sphi %s1749_s20, %s2037_s20   ;;  %s1695_s19 = sphi %s1747_s19, %s2036_s19   ;;  %s1691_s18 = sphi %s1745_s18, %s2035_s18  }
   0x5   : > { %p2023_p1 = scmp.eq.s32.totalorder %s1764_s22, 0  ;;  %p1224_p2 = scmp.ge.s32.totalorder %s1703_s21, 1 }
   0x6   : > { %p170_p3 = scmp.lt.s32.totalorder %s1703_s21, 3  ;;  %s1705_s25 = smov [#allocation4]  }
   0x7   : > { %p1772_p4 = por %p2023_p1, %p91_p0  ;;  %s182_s26 = sshll.u32 %s1705_s25, 4  ;;  %s183_s26 = int_to_ptr.vmem [resolvable:$true] %s182_s26 }
   0x8   : > { %p1776_p5 = pnand %p1224_p2, %p170_p3  ;;  %s1789_s28 = sadd.s32 1, %s1703_s21  }
   0x9   : > { %s2026_s23 = scalar_select %p1772_p4, 1, 0 }
   0xa   : > { %s2027_s24 = scalar_select %p1776_p5, 1, 0 }
   0xb   : > { %p1531_p6 = pneg %p1776_p5  ;;  %s78_s29 = sadd.s32 1, %s1699_s20 }
   0xc   : > { %s75_s30 = ssub.s32 %s1703_s21, %s1789_s28  ;;  %s1607_s8 = scalar_lea.hbm %s2020_s3, 1152 }
   0xd   : > { %p1784_p7 = pnand %p1531_p6, %p2023_p1  ;;  %p1608_p8 = scmp.ne.s32.totalorder %s2020_s3, %s1607_s8 }
   0xe   : > { %p1614_p12 = scmp.lt.u32.totalorder %s1607_s8, %s2020_s3 }
   0xf   : > { %p1609_p9 = pneg %p1784_p7 }
  0x11   : > { %p1610_p10 = pnand %p1609_p9, %p1608_p8 }
  0x13   : > { %p1611_p11 = pneg %p1610_p10 }
  0x15   : > { %p1616_p13 = pnand %p1614_p12, %p1611_p11 }
  0x17   : > { %1619 = shalt.err (!%p1616_p13)
}
  0x18   : > { %s1620_s13 = scalar_lea.vmem %s183_s26, 1152  ;;  %p1628_p6 = scmp.lt.s32.totalorder %s183_s26, %s183_s26 }
  0x19   : > { %p1621_p0 = scmp.ne.s32.totalorder %s183_s26, %s1620_s13  ;;  %p1629_p1 = scmp.lt.s32.totalorder %s1620_s13, %s1620_s13 }
  0x1b   : > { %p1623_p2 = pnand %p1621_p0, %p1609_p9  ;;  %p1630_p4 = por %p1629_p1, %p1628_p6 }
  0x1d   : > { %p1624_p3 = pneg %p1623_p2 }
  0x1f   : > { %p1631_p5 = pnand %p1630_p4, %p1624_p3 }
  0x21   : > { %1634 = shalt.err (!%p1631_p5)
}
  0x22   : > { %s1706_s14 = smov 64   ;;  %s1707_s15 = smov 4  }
  0x23   : > { %1534 = dma.hbm_to_vmem [thread:$0]  (!%p1784_p7), %s2020_s3, 1152, %s183_s26, [#allocation5], %s1706_s14, %s1706_s14, %s1707_s15  }
  0x24   : > { %p76_p8 = scmp.eq.s32.totalorder %s75_s30, 0  ;;  %p85_p9 = scmp.ne.s32.totalorder %s1699_s20, %s1695_s19 }
  0x25   : > { %p86_p1 = scmp.eq.s32.totalorder %s1703_s21, 0  ;;  %p1540_p4 = scmp.lt.s32.totalorder %s1703_s21, 2 }
  0x26   : > { %s1815_s18 = scalar_select %p76_p8, %s1699_s20, %s78_s29  }
  0x27   : > { %p87_p5 = por %p86_p1, %p85_p9  ;;  %s215_s25 = sand.u32 1, %s1699_s20  }
  0x28   : > { %s1227_s6 = sshll.u32 %s215_s25, 7  ;;  %s1274_s7 = sshll.u32 %s1703_s21, 11 }
  0x29   : > { %s1822_s10 = scalar_lea.hbm %s2019_s2, %s1274_s7  ;;  %s219_s26 = scalar_lea.vmem [#allocation2], %s1227_s6 }
  0x2a   : > { %s226_s27 = sshll.u32 %s219_s26, 4  ;;  %p1826_p7 = pnand %p1540_p4, %p87_p5  ;;  %s1824_s27 = int_to_ptr.vmem [resolvable:$true] %s226_s27 }
  0x2b   : > { %s1830_s21 = scalar_lea.sflag [#allocation3], %s215_s25  ;;  %s1635_s30 = scalar_lea.hbm %s1822_s10, 2048 }
  0x2c   : > { %p1636_p10 = scmp.ne.s32.totalorder %s1822_s10, %s1635_s30  ;;  %p1637_p11 = pneg %p1826_p7 }
  0x2d   : > { %s1640_s13 = scalar_lea.hbm %s2019_s2, 4096  ;;  %p1641_p0 = scmp.lt.u32.totalorder %s1822_s10, %s2019_s2 }
  0x2e   : > { %p1638_p12 = pnand %p1637_p11, %p1636_p10  ;;  %p1642_p2 = scmp.lt.u32.totalorder %s1640_s13, %s1635_s30 }
  0x2f   : > { %p1644_p6 = scmp.lt.u32.totalorder %s1635_s30, %s1822_s10 }
  0x30   : > { %p1639_p13 = pneg %p1638_p12  ;;  %p1643_p3 = por %p1642_p2, %p1641_p0 }
  0x32   : > { %p1645_p8 = por %p1644_p6, %p1643_p3 }
  0x34   : > { %p1646_p9 = pnand %p1645_p8, %p1639_p13 }
  0x36   : > { %1649 = shalt.err (!%p1646_p9)
}
  0x37   : > { %s1650_s16 = scalar_lea.vmem %s1824_s27, 2048  ;;  %s1708_s17 = smov [#allocation2]  }
  0x38   : > { %p1651_p1 = scmp.ne.s32.totalorder %s1824_s27, %s1650_s16  ;;  %s1655_s25 = sshll.u32 %s1708_s17, 4  ;;  %s1656_s25 = int_to_ptr.vmem [resolvable:$false] %s1655_s25 }
  0x39   : > { %s1657_s6 = scalar_lea.vmem %s1656_s25, 4096  ;;  %p1658_p10 = scmp.lt.s32.totalorder %s1824_s27, %s1656_s25 }
  0x3a   : > { %p1653_p4 = pnand %p1651_p1, %p1637_p11  ;;  %p1659_p12 = scmp.lt.s32.totalorder %s1657_s6, %s1650_s16 }
  0x3c   : > { %p1654_p5 = pneg %p1653_p4  ;;  %p1660_p0 = por %p1659_p12, %p1658_p10 }
  0x3e   : > { %p1661_p2 = pnand %p1660_p0, %p1654_p5 }
  0x40   : > { %1664 = shalt.err (!%p1661_p2)
}
  0x41   : > { %s1709_s7 = smov 128   ;;  %s1710_s8 = smov 8  }
  0x42   : > { %1538 = dma.hbm_to_vmem [thread:$0]  (!%p1826_p7), %s1822_s10, 2048, %s1824_s27, %s1830_s21, %s1709_s7, %s1709_s7, %s1710_s8  }
  0x43   : > { %p2030_p11 = scmp.ne.s32.totalorder %s2027_s24, 0 }
  0x44   : > { %s240_s9 = sand.u32 (!%p2030_p11), 1, %s1695_s19   ;;  %p2031_p13 = scmp.ne.s32.totalorder (!%p2030_p11), %s2026_s23, 0 }
  0x45   : > { %238 = sbr.rel (%p2030_p11) target bundleno = 1422 (0x58e), region = 40  ;;  %s1231_s26 = sshll.u32 (!%p2030_p11), %s240_s9, 7 }
  0x46   : > { %s241_s30 = scalar_lea.sflag (!%p2030_p11), [#allocation3], %s240_s9  ;;  %s1861_s11 = scalar_lea.vmem (!%p2030_p11), [#allocation2], %s1231_s26 }
  0x4c   : > { %1682 = dma.done.wait (%p2031_p13), %s241_s30, 2048  }
  0x4d   : > { %1684 = vsyncadd (%p2031_p13), %s241_s30, 4294965248  ;;  %p2032_p3 = scmp.eq.s32.totalorder %s1764_s22, 0 }
  0x4f   : > { %1686 = dma.done.wait (%p2032_p3), [#allocation5], 1152   ;;  %p2033_p7 = pmov %p2032_p3 }
  0x50   : > { %p283_p6 = scmp.lt.s32.totalorder %s1764_s22, 1  ;;  %v313_v16 = vld [vmem:[#allocation4 + $0x40] sm:$0xf]  ;;  %vm580_vm0 = vcmask 1043456   ;;  %vm555_vm1 = vcmask 64512   ;;  %v1600_v25 = vld [vmem:[#allocation4 + $0x8] sm:$0xff]  }
  0x51   : > { %1688 = vsyncadd (%p2033_p7), [#allocation5], 4294966144  ;;  %1524 = vmatprep.subr.msk.bf16.mxu1 %vm580_vm0, %v313_v16  ;;  %v582_v17 = vsel %vm580_vm0, %v313_v16, 0  ;;  %v1599_v18 = vld [vmem:[#allocation4] sm:$0xff]   ;;  %v1601_v28 = vld [vmem:[#allocation4 + $0x10] sm:$0xff]   ;;  %vm1712_vm2 = vmmov 0  }
  0x52   : > { %s2040_s22 = smov (!%p283_p6, %s1764_s22), 1  ;;  %1384 = vmatpush3.bf16.msra.mxu1 %v582_v17  ;;  %v1602_v33 = vld [vmem:[#allocation4 + $0x18] sm:$0xff]   ;;  %v1603_v36 = vld [vmem:[#allocation4 + $0x20] sm:$0xff]   ;;  %v1604_v41 = vld [vmem:[#allocation4 + $0x28] sm:$0xff]  }
  0x53   : > { %s1275_s24 = sshll.u32 %s2040_s22, 6  ;;  %1401 = vmatprep.subr.bf16.mxu1 %v1599_v18  ;;  %v1605_v48 = vld [vmem:[#allocation4 + $0x30] sm:$0xff]   ;;  %v1606_v49 = vld [vmem:[#allocation4 + $0x38] sm:$0xff]   ;;  %v1253_v50 = vld [vmem:[%s2021_s4] ss:$0 sm:$0xff]  ;;  %s295_s26 = scalar_lea.vmem %s2022_s5, %s2040_s22 }
  0x54   : > { %s292_s29 = scalar_lea.vmem %s2018_s1, %s1275_s24  ;;  %s1882_s12 = scalar_lea.vmem %s2017_s0, %s1275_s24 }
  0x55   : > { %v1583_v0 = vld [vmem:[%s292_s29] sm:$0xff]   ;;  %v1584_v1 = vld [vmem:[%s292_s29 + $0x8] sm:$0xff]   ;;  %v1585_v2 = vld [vmem:[%s292_s29 + $0x10] sm:$0xff]  }
  0x56   : > { %1351 = vmatprep.subr.bf16.mxu0 %v1583_v0  ;;  %v1586_v3 = vld [vmem:[%s292_s29 + $0x18] sm:$0xff]   ;;  %v1591_v4 = vld [vmem:[%s1882_s12] sm:$0xff]   ;;  %v1588_v6 = vld [vmem:[%s292_s29 + $0x28] sm:$0xff]  }
  0x57   : > { %1352 = vmatpush3.bf16.msra.mxu0 %v1583_v0  ;;  %1367 = vmatprep.mubr.bf16.mxu0 %v1591_v4  ;;  %v1587_v5 = vld [vmem:[%s292_s29 + $0x20] sm:$0xff]   ;;  %v1589_v7 = vld [vmem:[%s292_s29 + $0x30] sm:$0xff]   ;;  %v1590_v8 = vld [vmem:[%s292_s29 + $0x38] sm:$0xff]  }
  0x58   : > { %1353 = vmatprep.subr.bf16.mxu0 %v1584_v1  ;;  %v1886_v9 = vld [vmem:[%s1882_s12 + $0x8] sm:$0xff]   ;;  %v1889_v10 = vld [vmem:[%s1882_s12 + $0x10] sm:$0xff]   ;;  %v1894_v11 = vld [vmem:[%s1882_s12 + $0x18] sm:$0xff]  }
  0x59   : > { %v1897_v12 = vld [vmem:[%s1882_s12 + $0x20] sm:$0xff]   ;;  %v1902_v13 = vld [vmem:[%s1882_s12 + $0x28] sm:$0xff]   ;;  %v1905_v14 = vld [vmem:[%s1882_s12 + $0x30] sm:$0xff]  }
  0x5a   : > { %v1910_v15 = vld [vmem:[%s1882_s12 + $0x38] sm:$0xff]  }
  0x5b   : > { %1354 = vmatpush3.bf16.msra.mxu0 %v1584_v1 }
  0x5c   : > { %1355 = vmatprep.subr.bf16.mxu0 %v1585_v2 }
  0x5f   : > { %1356 = vmatpush3.bf16.msra.mxu0 %v1585_v2 }
  0x60   : > { %1357 = vmatprep.subr.bf16.mxu0 %v1586_v3 }
  0x63   : > { %1358 = vmatpush3.bf16.msra.mxu0 %v1586_v3 }
  0x64   : > { %1359 = vmatprep.subr.bf16.mxu0 %v1587_v5 }
  0x67   : > { %1360 = vmatpush3.bf16.msra.mxu0 %v1587_v5 }
  0x68   : > { %1361 = vmatprep.subr.bf16.mxu0 %v1588_v6 }
  0x6b   : > { %1362 = vmatpush3.bf16.msra.mxu0 %v1588_v6 }
  0x6c   : > { %1363 = vmatprep.subr.bf16.mxu0 %v1589_v7 }
  0x6f   : > { %1364 = vmatpush3.bf16.msra.mxu0 %v1589_v7 }
  0x70   : > { %1365 = vmatprep.subr.bf16.mxu0 %v1590_v8 }
  0x73   : > { %1366 = vmatpush3.bf16.msra.mxu0 %v1590_v8 }
  0x76   : > { %1368 = vmatmul.mubr.bf16.vlgmr.msra.gmra.mrb[0].mxu0 %v1886_v9 }
  0x77   : > { %1371 = vmatprep.mubr.bf16.mxu0 %v1889_v10 }
  0x7e   : > { %1372 = vmatmul.mubr.bf16.gmra.mrb[4].mxu0 %v1894_v11 }
  0x7f   : > { %1375 = vmatprep.mubr.bf16.mxu0 %v1897_v12 }
  0x86   : > { %1376 = vmatmul.mubr.bf16.gmra.mrb[8].mxu0 %v1902_v13 }
  0x87   : > { %1379 = vmatprep.mubr.bf16.mxu0 %v1905_v14 }
  0x8e   : > { %1380 = vmatmul.mubr.bf16.gmra.mrb[12].mxu0 %v1910_v15 }
  0x8f   : > { %1449 = vmatprep.mubr.bf16.mxu0 %v1591_v4 }
 0x149   : > { %v1369_v19 = vpop.f32.mrb[0].mxu0 }
 0x14a   : > { %v480_v20 = vpop.f32.mrb[1].mxu0 }
 0x14b   : > { %v1370_v21 = vpop.f32.mrb[2].mxu0 }
 0x14c   : > { %v544_v22 = vpack.c.bf16 %v1370_v21, %v1369_v19  ;;  %v483_v23 = vpop.f32.mrb[3].mxu0 }
 0x14d   : > { %v543_v24 = vpack.c.bf16 %v483_v23, %v480_v20 }
 0x14f   : > { %1385 = vmatprep.mubr.msk.bf16.mxu1 %vm555_vm1, %v543_v24 }
 0x150   : > { %1386 = vmatmul.mubr.msk.bf16.vlgmr.msra.gmra.mrb[0].mxu1 %vm555_vm1, %v544_v22 }
 0x151   : > { %v1373_v26 = vpop.f32.mrb[4].mxu0  ;;  %1402 = vmatpush3.bf16.msra.mxu1 %v1599_v18 }
 0x152   : > { %v496_v27 = vpop.f32.mrb[5].mxu0  ;;  %1403 = vmatprep.subr.bf16.mxu1 %v1600_v25 }
 0x153   : > { %v1374_v29 = vpop.f32.mrb[6].mxu0 }
 0x154   : > { %v546_v30 = vpack.c.bf16 %v1374_v29, %v1373_v26  ;;  %v499_v31 = vpop.f32.mrb[7].mxu0 }
 0x155   : > { %v545_v32 = vpack.c.bf16 %v499_v31, %v496_v27  ;;  %1404 = vmatpush3.bf16.msra.mxu1 %v1600_v25 }
 0x156   : > { %1405 = vmatprep.subr.bf16.mxu1 %v1601_v28 }
 0x157   : > { %1389 = vmatprep.mubr.msk.bf16.mxu1 %vm555_vm1, %v545_v32 }
 0x158   : > { %1390 = vmatmul.mubr.msk.bf16.gmra.mrb[4].mxu1 %vm555_vm1, %v546_v30 }
 0x159   : > { %v1377_v34 = vpop.f32.mrb[8].mxu0  ;;  %1406 = vmatpush3.bf16.msra.mxu1 %v1601_v28 }
 0x15a   : > { %v512_v35 = vpop.f32.mrb[9].mxu0  ;;  %1407 = vmatprep.subr.bf16.mxu1 %v1602_v33 }
 0x15b   : > { %v1378_v37 = vpop.f32.mrb[10].mxu0 }
 0x15c   : > { %v548_v38 = vpack.c.bf16 %v1378_v37, %v1377_v34  ;;  %v515_v39 = vpop.f32.mrb[11].mxu0 }
 0x15d   : > { %v547_v40 = vpack.c.bf16 %v515_v39, %v512_v35  ;;  %1408 = vmatpush3.bf16.msra.mxu1 %v1602_v33 }
 0x15e   : > { %1409 = vmatprep.subr.bf16.mxu1 %v1603_v36 }
 0x15f   : > { %1393 = vmatprep.mubr.msk.bf16.mxu1 %vm555_vm1, %v547_v40 }
 0x160   : > { %1394 = vmatmul.mubr.msk.bf16.gmra.mrb[8].mxu1 %vm555_vm1, %v548_v38 }
 0x161   : > { %v1381_v42 = vpop.f32.mrb[12].mxu0  ;;  %1410 = vmatpush3.bf16.msra.mxu1 %v1603_v36 }
 0x162   : > { %v528_v43 = vpop.f32.mrb[13].mxu0  ;;  %1411 = vmatprep.subr.bf16.mxu1 %v1604_v41 }
 0x163   : > { %v1382_v44 = vpop.f32.mrb[14].mxu0 }
 0x164   : > { %v550_v45 = vpack.c.bf16 %v1382_v44, %v1381_v42  ;;  %v531_v46 = vpop.f32.mrb[15].mxu0 }
 0x165   : > { %v549_v47 = vpack.c.bf16 %v531_v46, %v528_v43  ;;  %1412 = vmatpush3.bf16.msra.mxu1 %v1604_v41 }
 0x166   : > { %1413 = vmatprep.subr.bf16.mxu1 %v1605_v48 }
 0x167   : > { %1397 = vmatprep.mubr.msk.bf16.mxu1 %vm555_vm1, %v549_v47 }
 0x168   : > { %1398 = vmatmul.mubr.msk.bf16.gmra.mrb[12].mxu1 %vm555_vm1, %v550_v45 }
 0x169   : > { %1414 = vmatpush3.bf16.msra.mxu1 %v1605_v48 }
 0x16a   : > { %1415 = vmatprep.subr.bf16.mxu1 %v1606_v49 }
 0x16d   : > { %1416 = vmatpush3.bf16.msra.mxu1 %v1606_v49 }
 0x223   : > { %v1387_v51 = vpop.f32.mrb[0].mxu1 }
 0x224   : > { %v627_v52 = vadd.f32 %v1387_v51, %v1253_v50  ;;  %v618_v53 = vpop.f32.mrb[1].mxu1 }
 0x225   : > { %v619_v54 = vadd.f32 %v1253_v50, %v618_v53  ;;  %v1388_v55 = vpop.f32.mrb[2].mxu1 }
 0x226   : > { %v630_v56 = vadd.f32 %v1388_v55, %v1253_v50  ;;  %v621_v57 = vpop.f32.mrb[3].mxu1  ;;  %v683_v59 = vmax.f32 %v627_v52, 0.0 }
 0x227   : > { %v622_v58 = vadd.f32 %v1253_v50, %v621_v57  ;;  %v681_v61 = vmax.f32 %v619_v54, 0.0 }
 0x228   : > { %v684_v60 = vmax.f32 %v630_v56, 0.0 }
 0x229   : > { %v682_v62 = vmax.f32 %v622_v58, 0.0 }
 0x22a   : > { %v698_v63 = vpack.c.bf16 %v684_v60, %v683_v59 }
 0x22b   : > { %v697_v0 = vpack.c.bf16 %v682_v62, %v681_v61  ;;  %v1391_v1 = vpop.f32.mrb[4].mxu1 }
 0x22c   : > { %v643_v2 = vadd.f32 %v1391_v1, %v1253_v50  ;;  %v634_v3 = vpop.f32.mrb[5].mxu1 }
 0x22d   : > { %v635_v4 = vadd.f32 %v1253_v50, %v634_v3  ;;  %v1392_v5 = vpop.f32.mrb[6].mxu1  ;;  %1417 = vmatprep.mubr.bf16.mxu1 %v697_v0 }
 0x22e   : > { %v646_v6 = vadd.f32 %v1392_v5, %v1253_v50  ;;  %v637_v7 = vpop.f32.mrb[7].mxu1  ;;  %1418 = vmatmul.mubr.bf16.vlgmr.msra.gmra.mrb[16].mxu1 %v698_v63  ;;  %v687_v16 = vmax.f32 %v643_v2, 0.0 }
 0x22f   : > { %v638_v8 = vadd.f32 %v1253_v50, %v637_v7  ;;  %v685_v18 = vmax.f32 %v635_v4, 0.0 }
 0x230   : > { %v688_v17 = vmax.f32 %v646_v6, 0.0 }
 0x231   : > { %v686_v19 = vmax.f32 %v638_v8, 0.0 }
 0x232   : > { %v700_v20 = vpack.c.bf16 %v688_v17, %v687_v16  ;;  %v1934_v17 = vld [vmem:[%s2021_s4 + $0x1] ss:$0 sm:$0xff] }
 0x233   : > { %v699_v21 = vpack.c.bf16 %v686_v19, %v685_v18  ;;  %v1395_v22 = vpop.f32.mrb[8].mxu1 }
 0x234   : > { %v659_v23 = vadd.f32 %v1395_v22, %v1253_v50  ;;  %v650_v24 = vpop.f32.mrb[9].mxu1 }
 0x235   : > { %v651_v25 = vadd.f32 %v1253_v50, %v650_v24  ;;  %v1396_v26 = vpop.f32.mrb[10].mxu1  ;;  %1421 = vmatprep.mubr.bf16.mxu1 %v699_v21 }
 0x236   : > { %v662_v27 = vadd.f32 %v1396_v26, %v1253_v50  ;;  %v653_v28 = vpop.f32.mrb[11].mxu1  ;;  %1422 = vmatmul.mubr.bf16.gmra.mrb[20].mxu1 %v700_v20  ;;  %v691_v30 = vmax.f32 %v659_v23, 0.0 }
 0x237   : > { %v654_v29 = vadd.f32 %v1253_v50, %v653_v28  ;;  %v689_v32 = vmax.f32 %v651_v25, 0.0 }
 0x238   : > { %v692_v31 = vmax.f32 %v662_v27, 0.0 }
 0x239   : > { %v690_v33 = vmax.f32 %v654_v29, 0.0 }
 0x23a   : > { %v702_v34 = vpack.c.bf16 %v692_v31, %v691_v30 }
 0x23b   : > { %v701_v35 = vpack.c.bf16 %v690_v33, %v689_v32  ;;  %v1399_v36 = vpop.f32.mrb[12].mxu1 }
 0x23c   : > { %v675_v37 = vadd.f32 %v1399_v36, %v1253_v50  ;;  %v666_v38 = vpop.f32.mrb[13].mxu1 }
 0x23d   : > { %v667_v39 = vadd.f32 %v1253_v50, %v666_v38  ;;  %v1400_v40 = vpop.f32.mrb[14].mxu1  ;;  %1425 = vmatprep.mubr.bf16.mxu1 %v701_v35 }
 0x23e   : > { %v678_v41 = vadd.f32 %v1400_v40, %v1253_v50  ;;  %v669_v42 = vpop.f32.mrb[15].mxu1  ;;  %1426 = vmatmul.mubr.bf16.gmra.mrb[24].mxu1 %v702_v34  ;;  %v695_v44 = vmax.f32 %v675_v37, 0.0 }
 0x23f   : > { %v670_v43 = vadd.f32 %v1253_v50, %v669_v42  ;;  %v693_v46 = vmax.f32 %v667_v39, 0.0 }
 0x240   : > { %v696_v45 = vmax.f32 %v678_v41, 0.0 }
 0x241   : > { %v694_v47 = vmax.f32 %v670_v43, 0.0 }
 0x242   : > { %v704_v48 = vpack.c.bf16 %v696_v45, %v695_v44 }
 0x243   : > { %v703_v49 = vpack.c.bf16 %v694_v47, %v693_v46 }
 0x245   : > { %1429 = vmatprep.mubr.bf16.mxu1 %v703_v49 }
 0x246   : > { %1430 = vmatmul.mubr.bf16.gmra.mrb[28].mxu1 %v704_v48 }
 0x301   : > { %v1419_v51 = vpop.f32.mrb[16].mxu1 }
 0x302   : > { %v787_v52 = vpop.f32.mrb[17].mxu1 }
 0x303   : > { %v1420_v53 = vpop.f32.mrb[18].mxu1 }
 0x304   : > { %v851_v54 = vpack.c.bf16 %v1420_v53, %v1419_v51  ;;  %v790_v55 = vpop.f32.mrb[19].mxu1 }
 0x305   : > { %v850_v56 = vpack.c.bf16 %v790_v55, %v787_v52 }
 0x307   : > { %1433 = vmatprep.subr.bf16.mxu0 %v850_v56 }
 0x308   : > { %1434 = vmatpush3.bf16.msra.mxu0 %v850_v56 }
 0x309   : > { %v1423_v57 = vpop.f32.mrb[20].mxu1  ;;  %1435 = vmatprep.subr.bf16.mxu0 %v851_v54 }
 0x30a   : > { %v803_v58 = vpop.f32.mrb[21].mxu1 }
 0x30b   : > { %v1424_v50 = vpop.f32.mrb[22].mxu1 }
 0x30c   : > { %v853_v59 = vpack.c.bf16 %v1424_v50, %v1423_v57  ;;  %v806_v60 = vpop.f32.mrb[23].mxu1  ;;  %1436 = vmatpush3.bf16.msra.mxu0 %v851_v54 }
 0x30d   : > { %v852_v61 = vpack.c.bf16 %v806_v60, %v803_v58 }
 0x30f   : > { %1437 = vmatprep.subr.bf16.mxu0 %v852_v61 }
 0x310   : > { %1438 = vmatpush3.bf16.msra.mxu0 %v852_v61 }
 0x311   : > { %v1427_v62 = vpop.f32.mrb[24].mxu1  ;;  %1439 = vmatprep.subr.bf16.mxu0 %v853_v59 }
 0x312   : > { %v819_v63 = vpop.f32.mrb[25].mxu1 }
 0x313   : > { %v1428_v0 = vpop.f32.mrb[26].mxu1 }
 0x314   : > { %v855_v1 = vpack.c.bf16 %v1428_v0, %v1427_v62  ;;  %v822_v2 = vpop.f32.mrb[27].mxu1  ;;  %1440 = vmatpush3.bf16.msra.mxu0 %v853_v59 }
 0x315   : > { %v854_v3 = vpack.c.bf16 %v822_v2, %v819_v63 }
 0x317   : > { %1441 = vmatprep.subr.bf16.mxu0 %v854_v3 }
 0x318   : > { %1442 = vmatpush3.bf16.msra.mxu0 %v854_v3 }
 0x319   : > { %v1431_v4 = vpop.f32.mrb[28].mxu1  ;;  %1443 = vmatprep.subr.bf16.mxu0 %v855_v1 }
 0x31a   : > { %v835_v5 = vpop.f32.mrb[29].mxu1 }
 0x31b   : > { %v1432_v6 = vpop.f32.mrb[30].mxu1 }
 0x31c   : > { %v857_v7 = vpack.c.bf16 %v1432_v6, %v1431_v4  ;;  %v838_v8 = vpop.f32.mrb[31].mxu1  ;;  %1444 = vmatpush3.bf16.msra.mxu0 %v855_v1 }
 0x31d   : > { %v856_v16 = vpack.c.bf16 %v838_v8, %v835_v5  ;;  %v1711_v5 = vmov 0.0|0.0  }
 0x31e   : > { %1500 = vmatprep.subr.bf16.mxu1 %v1711_v5 }
 0x31f   : > { %1445 = vmatprep.subr.bf16.mxu0 %v856_v16 }
 0x320   : > { %1446 = vmatpush3.bf16.msra.mxu0 %v856_v16 }
 0x321   : > { %1447 = vmatprep.subr.bf16.mxu0 %v857_v7 }
 0x324   : > { %1448 = vmatpush3.bf16.msra.mxu0 %v857_v7 }
 0x327   : > { %1450 = vmatmul.mubr.bf16.vlgmr.msra.gmra.mrb[16].mxu0 %v1886_v9 }
 0x328   : > { %1453 = vmatprep.mubr.bf16.mxu0 %v1889_v10 }
 0x32f   : > { %1454 = vmatmul.mubr.bf16.gmra.mrb[20].mxu0 %v1894_v11 }
 0x330   : > { %1457 = vmatprep.mubr.bf16.mxu0 %v1897_v12  ;;  %v1941_v12 = vld [vmem:[%s2021_s4 + $0x2] ss:$0 sm:$0xff] }
 0x337   : > { %1458 = vmatmul.mubr.bf16.gmra.mrb[24].mxu0 %v1902_v13 }
 0x338   : > { %1461 = vmatprep.mubr.bf16.mxu0 %v1905_v14 }
 0x33f   : > { %1462 = vmatmul.mubr.bf16.gmra.mrb[28].mxu0 %v1910_v15 }
 0x3fa   : > { %v1451_v18 = vpop.f32.mrb[16].mxu0 }
 0x3fb   : > { %v905_v9 = vadd.f32 %v1451_v18, %v1934_v17  ;;  %v896_v19 = vpop.f32.mrb[17].mxu0 }
 0x3fc   : > { %v897_v10 = vadd.f32 %v1934_v17, %v896_v19  ;;  %v1452_v11 = vpop.f32.mrb[18].mxu0  ;;  %v1713_v19 = vmov 0.0  }
 0x3fd   : > { %v961_v13 = vmax.f32 %v905_v9, 0.0  ;;  %v908_v14 = vadd.f32 %v1452_v11, %v1934_v17  ;;  %v899_v15 = vpop.f32.mrb[19].mxu0  ;;  %1497 = vmatprep.mubr.msk.f32.mxu1 %vm1712_vm2, %v1713_v19 }
 0x3fe   : > { %v959_v20 = vmax.f32 %v897_v10, 0.0  ;;  %v900_v21 = vadd.f32 %v1934_v17, %v899_v15  ;;  %v1030_v15 = vld [vmem:[%s1861_s11 + $0x18] sm:$0xff] }
 0x3ff   : > { %v962_v22 = vmax.f32 %v908_v14, 0.0  ;;  %v981_v23 = vmul.f32 %v1941_v12, %v961_v13  ;;  %v1027_v13 = vld [vmem:[%s1861_s11] sm:$0xff]  ;;  %v1028_v14 = vld [vmem:[%s1861_s11 + $0x8] sm:$0xff] }
 0x400   : > { %v960_v24 = vmax.f32 %v900_v21, 0.0  ;;  %v979_v25 = vmul.f32 %v1941_v12, %v959_v20 }
 0x401   : > { %999 = vadd.xlane.f32.xlu1 %v981_v23  ;;  %v982_v28 = vmul.f32 %v1941_v12, %v962_v22 }
 0x402   : > { %v1455_v26 = vpop.f32.mrb[20].mxu0  ;;  %995 = vadd.xlane.f32.xlu0 %v979_v25  ;;  %v980_v32 = vmul.f32 %v1941_v12, %v960_v24  ;;  %v1029_v24 = vld [vmem:[%s1861_s11 + $0x10] sm:$0xff] }
 0x403   : > { %v912_v27 = vpop.f32.mrb[21].mxu0  ;;  %v921_v29 = vadd.f32 %v1455_v26, %v1934_v17  ;;  %v1031_v26 = vld [vmem:[%s1861_s11 + $0x20] sm:$0xff] }
 0x404   : > { %v913_v30 = vadd.f32 %v1934_v17, %v912_v27  ;;  %v1456_v31 = vpop.f32.mrb[22].mxu0 }
 0x405   : > { %1001 = vadd.xlane.f32.xlu1 %v982_v28  ;;  %v915_v33 = vpop.f32.mrb[23].mxu0  ;;  %v924_v35 = vadd.f32 %v1456_v31, %v1934_v17  ;;  %v965_v37 = vmax.f32 %v921_v29, 0.0  ;;  %v1032_v28 = vld [vmem:[%s1861_s11 + $0x28] sm:$0xff] }
 0x406   : > { %v963_v34 = vmax.f32 %v913_v30, 0.0  ;;  %v916_v36 = vadd.f32 %v1934_v17, %v915_v33  ;;  %997 = vadd.xlane.f32.xlu0 %v980_v32 }
 0x407   : > { %v966_v40 = vmax.f32 %v924_v35, 0.0  ;;  %v985_v47 = vmul.f32 %v1941_v12, %v965_v37  ;;  %v1034_v35 = vld [vmem:[%s1861_s11 + $0x38] sm:$0xff] }
 0x408   : > { %v964_v38 = vmax.f32 %v916_v36, 0.0  ;;  %v983_v39 = vmul.f32 %v1941_v12, %v963_v34  ;;  %v1033_v36 = vld [vmem:[%s1861_s11 + $0x30] sm:$0xff] }
 0x409   : > { %v986_v53 = vmul.f32 %v1941_v12, %v966_v40  ;;  %v1035_v40 = vld [vmem:[%s1861_s11 + $0x40] sm:$0xff] }
 0x40a   : > { %v1459_v41 = vpop.f32.mrb[24].mxu0  ;;  %1003 = vadd.xlane.f32.xlu0 %v983_v39  ;;  %v984_v42 = vmul.f32 %v1941_v12, %v964_v38 }
 0x40b   : > { %v928_v43 = vpop.f32.mrb[25].mxu0  ;;  %v937_v44 = vadd.f32 %v1459_v41, %v1934_v17 }
 0x40c   : > { %v929_v45 = vadd.f32 %v1934_v17, %v928_v43  ;;  %v1460_v46 = vpop.f32.mrb[26].mxu0  ;;  %1005 = vadd.xlane.f32.xlu1 %v984_v42  ;;  %v1036_v42 = vld [vmem:[%s1861_s11 + $0x48] sm:$0xff] }
 0x40d   : > { %v940_v48 = vadd.f32 %v1460_v46, %v1934_v17  ;;  %v931_v49 = vpop.f32.mrb[27].mxu0  ;;  %v969_v54 = vmax.f32 %v937_v44, 0.0 }
 0x40e   : > { %v967_v51 = vmax.f32 %v929_v45, 0.0  ;;  %v932_v52 = vadd.f32 %v1934_v17, %v931_v49  ;;  %1007 = vadd.xlane.f32.xlu0 %v985_v47  ;;  %v1038_v49 = vld [vmem:[%s1861_s11 + $0x58] sm:$0xff] }
 0x40f   : > { %v970_v57 = vmax.f32 %v940_v48, 0.0  ;;  %v989_v63 = vmul.f32 %v1941_v12, %v969_v54 }
 0x410   : > { %v968_v55 = vmax.f32 %v932_v52, 0.0  ;;  %1009 = vadd.xlane.f32.xlu1 %v986_v53  ;;  %v987_v56 = vmul.f32 %v1941_v12, %v967_v51  ;;  %v1037_v51 = vld [vmem:[%s1861_s11 + $0x50] sm:$0xff] }
 0x411   : > { %v990_v1 = vmul.f32 %v1941_v12, %v970_v57  ;;  %v1040_v57 = vld [vmem:[%s1861_s11 + $0x68] sm:$0xff] }
 0x412   : > { %v1463_v58 = vpop.f32.mrb[28].mxu0  ;;  %1011 = vadd.xlane.f32.xlu0 %v987_v56  ;;  %v988_v50 = vmul.f32 %v1941_v12, %v968_v55  ;;  %v1039_v55 = vld [vmem:[%s1861_s11 + $0x60] sm:$0xff] }
 0x413   : > { %v944_v59 = vpop.f32.mrb[29].mxu0  ;;  %v953_v60 = vadd.f32 %v1463_v58, %v1934_v17 }
 0x414   : > { %v945_v61 = vadd.f32 %v1934_v17, %v944_v59  ;;  %v1464_v62 = vpop.f32.mrb[30].mxu0  ;;  %1013 = vadd.xlane.f32.xlu1 %v988_v50 }
 0x415   : > { %v947_v0 = vpop.f32.mrb[31].mxu0  ;;  %v956_v3 = vadd.f32 %v1464_v62, %v1934_v17  ;;  %v973_v6 = vmax.f32 %v953_v60, 0.0  ;;  %v1042_v62 = vld [vmem:[%s1861_s11 + $0x78] sm:$0xff] }
 0x416   : > { %v971_v2 = vmax.f32 %v945_v61, 0.0  ;;  %v948_v4 = vadd.f32 %v1934_v17, %v947_v0  ;;  %1015 = vadd.xlane.f32.xlu0 %v989_v63  ;;  %v1041_v63 = vld [vmem:[%s1861_s11 + $0x70] sm:$0xff] }
 0x417   : > { %v974_v16 = vmax.f32 %v956_v3, 0.0  ;;  %v993_v9 = vmul.f32 %v1941_v12, %v973_v6 }
 0x418   : > { %v972_v7 = vmax.f32 %v948_v4, 0.0  ;;  %1017 = vadd.xlane.f32.xlu1 %v990_v1  ;;  %v991_v8 = vmul.f32 %v1941_v12, %v971_v2 }
 0x419   : > { %v994_v17 = vmul.f32 %v1941_v12, %v974_v16 }
 0x41a   : > { %1019 = vadd.xlane.f32.xlu0 %v991_v8  ;;  %v992_v18 = vmul.f32 %v1941_v12, %v972_v7  ;;  %v1714_v7 = vmov 1.0   ;;  %v333_v8 = vld [vmem:[%s2021_s4 + $0x3] sm:$0x1] }
 0x41c   : > { %1021 = vadd.xlane.f32.xlu1 %v992_v18 }
 0x41e   : > { %1023 = vadd.xlane.f32.xlu0 %v993_v9 }
 0x420   : > { %1025 = vadd.xlane.f32.xlu1 %v994_v17 }
 0x48e   : > { %v1000_v10 = vpop.xlane.xlu1 %999 }
 0x48f   : > { %v996_v11 = vpop.xlane.xlu0 %995  ;;  %v1045_v29 = vmul.f32 %v1029_v24, %v1000_v10 }
 0x490   : > { %v1043_v22 = vmul.f32 %v1027_v13, %v996_v11 }
 0x492   : > { %v1002_v20 = vpop.xlane.xlu1 %1001 }
 0x493   : > { %v998_v21 = vpop.xlane.xlu0 %997  ;;  %v1046_v25 = vmul.f32 %v1030_v15, %v1002_v20 }
 0x494   : > { %v1044_v23 = vmul.f32 %v1028_v14, %v998_v21 }
 0x495   : > { %v1504_v31 = vpack.c.bf16 %v1046_v25, %v1045_v29 }
 0x496   : > { %v1501_v12 = vpack.c.bf16 %v1044_v23, %v1043_v22 }
 0x497   : > { %v1004_v27 = vpop.xlane.xlu0 %1003 }
 0x498   : > { %1502 = vmatpush3.bf16.msra.mxu1 %v1501_v12  ;;  %v1047_v32 = vmul.f32 %v1031_v26, %v1004_v27 }
 0x499   : > { %v1006_v30 = vpop.xlane.xlu1 %1005  ;;  %1503 = vmatprep.subr.bf16.mxu1 %v1711_v5 }
 0x49a   : > { %v1048_v33 = vmul.f32 %v1032_v28, %v1006_v30 }
 0x49b   : > { %v1008_v34 = vpop.xlane.xlu0 %1007 }
 0x49c   : > { %1505 = vmatpush3.bf16.msra.mxu1 %v1504_v31  ;;  %v1507_v38 = vpack.c.bf16 %v1048_v33, %v1047_v32  ;;  %v1049_v43 = vmul.f32 %v1033_v36, %v1008_v34 }
 0x49d   : > { %v1010_v37 = vpop.xlane.xlu1 %1009  ;;  %1506 = vmatprep.subr.bf16.mxu1 %v1711_v5 }
 0x49e   : > { %v1050_v39 = vmul.f32 %v1034_v35, %v1010_v37 }
 0x49f   : > { %v1012_v41 = vpop.xlane.xlu0 %1011 }
 0x4a0   : > { %1508 = vmatpush3.bf16.msra.mxu1 %v1507_v38  ;;  %v1510_v45 = vpack.c.bf16 %v1050_v39, %v1049_v43  ;;  %v1051_v46 = vmul.f32 %v1035_v40, %v1012_v41 }
 0x4a1   : > { %v1014_v44 = vpop.xlane.xlu1 %1013  ;;  %1509 = vmatprep.subr.bf16.mxu1 %v1711_v5 }
 0x4a2   : > { %v1052_v47 = vmul.f32 %v1036_v42, %v1014_v44 }
 0x4a3   : > { %v1016_v48 = vpop.xlane.xlu0 %1015 }
 0x4a4   : > { %1511 = vmatpush3.bf16.msra.mxu1 %v1510_v45  ;;  %v1513_v53 = vpack.c.bf16 %v1052_v47, %v1051_v46  ;;  %v1053_v58 = vmul.f32 %v1037_v51, %v1016_v48 }
 0x4a5   : > { %v1018_v52 = vpop.xlane.xlu1 %1017  ;;  %1512 = vmatprep.subr.bf16.mxu1 %v1711_v5 }
 0x4a6   : > { %v1054_v54 = vmul.f32 %v1038_v49, %v1018_v52 }
 0x4a7   : > { %v1020_v56 = vpop.xlane.xlu0 %1019 }
 0x4a8   : > { %1514 = vmatpush3.bf16.msra.mxu1 %v1513_v53  ;;  %v1516_v59 = vpack.c.bf16 %v1054_v54, %v1053_v58  ;;  %v1055_v60 = vmul.f32 %v1039_v55, %v1020_v56 }
 0x4a9   : > { %v1022_v50 = vpop.xlane.xlu1 %1021  ;;  %1515 = vmatprep.subr.bf16.mxu1 %v1711_v5 }
 0x4aa   : > { %v1056_v61 = vmul.f32 %v1040_v57, %v1022_v50 }
 0x4ab   : > { %v1024_v0 = vpop.xlane.xlu0 %1023 }
 0x4ac   : > { %1517 = vmatpush3.bf16.msra.mxu1 %v1516_v59  ;;  %v1519_v2 = vpack.c.bf16 %v1056_v61, %v1055_v60  ;;  %v1057_v4 = vmul.f32 %v1041_v63, %v1024_v0 }
 0x4ad   : > { %v1026_v1 = vpop.xlane.xlu1 %1025  ;;  %1518 = vmatprep.subr.bf16.mxu1 %v1711_v5 }
 0x4ae   : > { %v1058_v3 = vmul.f32 %v1042_v62, %v1026_v1 }
 0x4b0   : > { %1520 = vmatpush3.bf16.msra.mxu1 %v1519_v2  ;;  %v1522_v6 = vpack.c.bf16 %v1058_v3, %v1057_v4 }
 0x4b1   : > { %1521 = vmatprep.subr.bf16.mxu1 %v1711_v5 }
 0x4b4   : > { %1523 = vmatpush3.bf16.msra.mxu1 %v1522_v6 }
 0x4b7   : > { %1498 = vmatmul.mubr.f32.vlgmr.msra.gmra.mrb[32].mxu1 %v1714_v7 }
 0x58a   : > { %v1125_v16 = vpop.f32.mrb[32].mxu1 }
 0x58b   : > { %v1126_v18 = vadd.f32 %v1125_v16, %v333_v8  ;;  %v1499_v9 = vpop.f32.mrb[33].mxu1 }
 0x58d   : > { %1129 = vst [vmem:[%s295_s26] sm:$0x1] %v1126_v18 }
 0x58e PF: > { %s2034_s30 = smov %s1815_s18  ;;  %p16_p8 = scmp.ge.s32.totalorder %s1789_s28, 4  }
 0x58f   : > { %s2035_s18 = smov %s1695_s19  ;;  %s2036_s19 = smov %s1699_s20 }
 0x590   : > { %s2037_s20 = smov %s2034_s30  ;;  %s2038_s21 = smov %s1789_s28 }
 0x591   :  { %18 = sbr.rel (!%p16_p8) target bundleno = 4 (0x4), region = 90 }
 0x598   :  { %1147 = vsyncpa [#allocation3], 1 }
 0x599   :  { %1149 = vsyncpa [#allocation3 + $0x1], 1 }
 0x59a   :  { %1150 = vsyncpa [#allocation5], 1 }

</bundles_post_ra>
